<compile_context>
chip_gen: v7x
topology: tpu7x:2x2x1
jax: 0.10.0
libtpu: 0.0.40
codegen_flags: <defaults>
</compile_context>

<pallas_src>
import jax
import jax.numpy as jnp
from jax.experimental import pallas as pl
from jax.experimental.pallas import tpu as pltpu


_LANE = 128
_SUBLANE_BASE = 8


def _sublane_unit(dtype):
    """Sublane packing unit: 8 rows for 32-bit, 16 for 16-bit, 32 for 8-bit."""
    bits = jnp.dtype(dtype).itemsize * 8
    return _SUBLANE_BASE * max(1, 32 // bits)


def _pick_lane_tile(hw, lane_target):
    """Lane-axis tile: multiple of 128 whenever possible (lane-dense stores)."""
    if hw <= _LANE:
        return hw                                   # full extent; tiny, unavoidable mask
    if hw <= lane_target:
        if hw % _LANE == 0:
            return hw                               # full extent, lane-dense
        return (hw // _LANE) * _LANE                # one masked edge tile only
    return max(_LANE, (lane_target // _LANE) * _LANE)


def _pick_row_tile(rows, unit, thw, dtype_bytes, tile_bytes):
    """Row-axis tile sized so tr*thw*dtype_bytes ~= tile_bytes."""
    target = max(unit, tile_bytes // max(1, thw * dtype_bytes))
    target = max(unit, (target // unit) * unit)
    if rows <= target:
        return rows                                 # full extent is always legal
    return target


def _scale_mul_kernel(x_ref, s_ref, o_ref):
    # x_ref: (TR, THW) tile of the flattened (B*C, H*W) activations
    # s_ref: (TR, 1)   f32 per-row (== per (batch, channel)) scale
    # o_ref: (TR, THW)
    x = x_ref[...]
    s = s_ref[...].astype(x.dtype)                  # tiny (TR, 1) cast
    o_ref[...] = (x * s).astype(o_ref.dtype)


def scaling_net(x, lambda_rd, w1, b1, w2, b2, *,
                tile_bytes=4 * 1024 * 1024, lane_target=8192):
    """Pallas ScalingNet forward.

    x: (B, C, H, W); lambda_rd: (B, 1); w1: (C//2, 1); b1: (C//2,);
    w2: (C, C//2); b2: (C,).
    Returns x * exp(fc2(relu(fc1(lambda_rd)))) broadcast per (batch, channel).
    """
    B, C, H, W = x.shape
    HW = H * W
    R = B * C
    dtype_bytes = jnp.dtype(x.dtype).itemsize

    # ---- tiny MLP on lambda_rd (B*C values), hoisted out of the hot loop ----
    lam = lambda_rd.reshape(B, 1).astype(jnp.float32)
    w1m = w1.astype(jnp.float32)                     # (C//2, 1)
    b1v = b1.astype(jnp.float32)                     # (C//2,)
    w2m = w2.astype(jnp.float32)                     # (C, C//2)
    b2v = b2.astype(jnp.float32)                     # (C,)

    h = jnp.maximum(lam @ w1m.T + b1v, 0.0)          # (B, C//2)
    s = jnp.exp(h @ w2m.T + b2v)                     # (B, C) f32
    s_col = s.reshape(R, 1)                          # per-row scale column

    # ---- HBM-bandwidth-bound elementwise hot path (the Pallas kernel) -------
    x2 = x.reshape(R, HW)

    # Keep 4 double-buffered tiles comfortably under the 48 MiB VMEM cap.
    tile_bytes = min(int(tile_bytes), 10 * 1024 * 1024)
    thw = _pick_lane_tile(HW, lane_target)
    tr = _pick_row_tile(R, _sublane_unit(x.dtype), thw, dtype_bytes, tile_bytes)
    grid = (pl.cdiv(R, tr), pl.cdiv(HW, thw))

    # Explicit VMEM budget: 2 in + 2 out tile buffers + scale column + slack.
    tile_buf = tr * thw * dtype_bytes
    needed = 4 * tile_buf + 2 * tr * 4 + (1 << 20)
    vmem_limit = int(min(48 * 1024 * 1024, max(needed, 32 * 1024 * 1024)))

    cost = pl.CostEstimate(
        flops=int(R) * int(HW),
        transcendentals=0,
        bytes_accessed=2 * int(R) * int(HW) * int(dtype_bytes) + int(R) * 4,
    )

    out = pl.pallas_call(
        _scale_mul_kernel,
        out_shape=jax.ShapeDtypeStruct((R, HW), x.dtype),
        grid_spec=pl.GridSpec(
            grid=grid,
            in_specs=[
                pl.BlockSpec((tr, thw), lambda i, j: (i, j)),   # x tile
                pl.BlockSpec((tr, 1), lambda i, j: (i, 0)),     # scale column
            ],
            out_specs=pl.BlockSpec((tr, thw), lambda i, j: (i, j)),
        ),
        compiler_params=pltpu.CompilerParams(
            dimension_semantics=("parallel", "parallel"),
            vmem_limit_bytes=vmem_limit,
        ),
        cost_estimate=cost,
    )(x2, s_col)

    return out.reshape(B, C, H, W)


def scaling_net_ref(x, lambda_rd, w1, b1, w2, b2):
    """Pure-JAX f32 reference mirroring the PyTorch forward."""
    xf = x.astype(jnp.float32)
    h = jnp.maximum(lambda_rd.astype(jnp.float32) @ w1.T + b1, 0.0)
    s = jnp.exp(h @ w2.T + b2)
    return xf * s[:, :, None, None]


def _make_params(key, C):
    Ch = C // 2
    kw1, kb1, kw2, kb2 = jax.random.split(key, 4)
    # fc1: PyTorch-default-style uniform init (fan_in = 1 -> U(-1, 1)).
    w1 = jax.random.uniform(kw1, (Ch, 1), minval=-1.0, maxval=1.0, dtype=jnp.float32)
    b1 = jax.random.uniform(kb1, (Ch,), minval=-1.0, maxval=1.0, dtype=jnp.float32)
    # NOTE: the PyTorch module zero-inits fc2 (scale == exp(0) == 1); use small
    # nonzero values so the test exercises the full kernel math.
    w2 = 0.1 * jax.random.normal(kw2, (C, Ch), dtype=jnp.float32)
    b2 = 0.1 * jax.random.normal(kb2, (C,), dtype=jnp.float32)
    return w1, b1, w2, b2


if __name__ == "__main__":
    key = jax.random.PRNGKey(0)
    k1, k2 = jax.random.split(key)

    # ---- Test 1: f32, lane-aligned shapes (matches the module's intent) -----
    B, C, H, W = 2, 4, 16, 16
    kx, kl, kp = jax.random.split(k1, 3)
    x = jax.random.normal(kx, (B, C, H, W), dtype=jnp.float32)
    lambda_rd = jax.random.uniform(kl, (B, 1), dtype=jnp.float32)
    w1, b1, w2, b2 = _make_params(kp, C)

    out = scaling_net(x, lambda_rd, w1, b1, w2, b2)
    out = jax.block_until_ready(out)
    ref = scaling_net_ref(x, lambda_rd, w1, b1, w2, b2)
    assert out.shape == (B, C, H, W)
    assert jnp.allclose(out, ref, rtol=1e-5, atol=1e-5), "f32 mismatch vs reference"

    # ---- Test 2: bf16, non-128-aligned H*W (masked edge tile + packed rows) --
    B2, C2, H2, W2 = 2, 6, 10, 13          # HW = 130 (not a multiple of 128)
    kx2, kl2, kp2 = jax.random.split(k2, 3)
    xb = jax.random.normal(kx2, (B2, C2, H2, W2), dtype=jnp.float32).astype(jnp.bfloat16)
    lb = jax.random.uniform(kl2, (B2, 1), dtype=jnp.float32)
    w1b, b1b, w2b, b2b = _make_params(kp2, C2)

    outb = scaling_net(xb, lb, w1b, b1b, w2b, b2b)
    outb = jax.block_until_ready(outb)
    refb = scaling_net_ref(xb, lb, w1b, b1b, w2b, b2b)
    assert outb.shape == (B2, C2, H2, W2)
    assert outb.dtype == jnp.bfloat16
    assert jnp.allclose(outb.astype(jnp.float32), refb, rtol=3e-2, atol=3e-2), \
        "bf16 mismatch vs reference"

    print("KERNEL_OK")
</pallas_src>

<mosaic_0001>
module attributes {stable_mosaic.version = 11 : i64} {
  func.func @_scale_mul_kernel(%arg0: i32, %arg1: i32, %arg2: memref<8x256xf32, #tpu.memory_space<vmem>>, %arg3: memref<8x1xf32, #tpu.memory_space<vmem>>, %arg4: memref<8x256xf32, #tpu.memory_space<vmem>>) attributes {dimension_semantics = [#tpu.dimension_semantics<parallel>, #tpu.dimension_semantics<parallel>], iteration_bounds = array<i64: 1, 1>, scalar_prefetch = 0 : i64, scratch_operands = 0 : i64, tpu.core_type = #tpu.core_type<tc>, window_params = [{transform_indices = @transform_0, window_bounds = array<i64: 8, 256>}, {transform_indices = @transform_1, window_bounds = array<i64: 8, 1>}, {transform_indices = @transform_2, window_bounds = array<i64: 8, 256>}]} {
    %c0 = arith.constant 0 : index
    %c0_0 = arith.constant 0 : index
    %0 = vector.load %arg2[%c0, %c0_0] : memref<8x256xf32, #tpu.memory_space<vmem>>, vector<8x256xf32>
    %c0_1 = arith.constant 0 : index
    %c0_2 = arith.constant 0 : index
    %1 = vector.load %arg3[%c0_1, %c0_2] : memref<8x1xf32, #tpu.memory_space<vmem>>, vector<8x1xf32>
    %2 = vector.broadcast %1 : vector<8x1xf32> to vector<8x256xf32>
    %3 = arith.mulf %0, %2 : vector<8x256xf32>
    %c0_3 = arith.constant 0 : index
    %c0_4 = arith.constant 0 : index
    %4 = vector.load %arg4[%c0_3, %c0_4] : memref<8x256xf32, #tpu.memory_space<vmem>>, vector<8x256xf32>
    tpu.vector_store %arg4[%c0_3, %c0_4], %3 {strides = array<i32>} : memref<8x256xf32, #tpu.memory_space<vmem>>, vector<8x256xf32>,
    return
  }
  func.func @transform_0(%arg0: i32, %arg1: i32) -> (i32, i32) {
    %c0_i32 = arith.constant 0 : i32
    return %arg0, %arg1 : i32, i32
  }
  func.func @transform_1(%arg0: i32, %arg1: i32) -> (i32, i32) {
    %c0_i32 = arith.constant 0 : i32
    %c0_i32_0 = arith.constant 0 : i32
    return %arg0, %c0_i32 : i32, i32
  }
  func.func @transform_2(%arg0: i32, %arg1: i32) -> (i32, i32) {
    %c0_i32 = arith.constant 0 : i32
    return %arg0, %arg1 : i32, i32
  }
}

</mosaic_0001>

<bundles_post_ra>
// kernel: tpu_custom_call.1
= control target key start
LH: loop header
LB: loop body
LE: loop exit
PB: predicated region body
PF: predicated region fallthrough
CT: control target
= control target key end

     0   :  { %7 = vsyncpa [#allocation3], 0  ;;  %s148_s0 = inlined_call_operand.hbm [shape: f32[8,256], index: 0, kind: input, shape index: {}]   ;;  %s149_s1 = inlined_call_operand.vmem [shape: f32[8,1], index: 1, kind: input, shape index: {}]   ;;  %s150_s2 = inlined_call_operand.hbm [shape: f32[8,256], index: 2, kind: output, shape index: {}]  }
   0x1   :  { %8 = vsyncpa [#allocation4], 0  ;;  %s103_s9 = smov [#allocation2]   ;;  %s55_s13 = scalar_lea.hbm %s148_s0, 256 }
   0x2   :  { %s15_s10 = sshll.u32 %s103_s9, 4  ;;  %p56_p0 = scmp.ne.s32.totalorder %s148_s0, %s55_s13  ;;  %s16_s10 = int_to_ptr.vmem [resolvable:$true] %s15_s10 }
   0x3   :  { %p59_p1 = scmp.lt.u32.totalorder %s55_s13, %s148_s0 }
   0x5   :  { %p61_p2 = pnand %p59_p1, %p56_p0 }
   0x7   :  { %64 = shalt.err (!%p61_p2)
}
   0x8   :  { %s65_s18 = scalar_lea.vmem %s16_s10, 256  ;;  %p70_p4 = scmp.lt.s32.totalorder %s16_s10, %s16_s10 }
   0x9   :  { %p66_p3 = scmp.ne.s32.totalorder %s16_s10, %s65_s18  ;;  %p71_p5 = scmp.lt.s32.totalorder %s65_s18, %s65_s18 }
   0xb   :  { %p72_p6 = por %p71_p5, %p70_p4 }
   0xd   :  { %p73_p7 = pnand %p72_p6, %p66_p3 }
   0xf   :  { %76 = shalt.err (!%p73_p7)
}
  0x10   :  { %18 = dma.hbm_to_vmem [thread:$0]  %s148_s0, 256, %s16_s10, [#allocation3]  }
  0x11   :  { %99 = dma.done.wait [#allocation3], 256  }
  0x12   :  { %100 = vsyncadd [#allocation3], 4294967040  ;;  %v104_v0 = vmov 0   ;;  %v26_v1 = vld [vmem:[%s149_s1] sm:$0xff]  ;;  %v25_v3 = vld [vmem:[#allocation2 + $0x8] sm:$0xff]  ;;  %s105_s23 = smov [#allocation5]  }
  0x13   :  { %54 = vset.pattern.permute.xlu0 %v104_v0  ;;  %v24_v2 = vld [vmem:[#allocation2] sm:$0xff]  ;;  %s42_s24 = sshll.u32 %s105_s23, 4  ;;  %s43_s24 = int_to_ptr.vmem [resolvable:$true] %s42_s24 }
  0x14   :  { %29 = vperm.xlu0 %54, %v26_v1   ;;  %s77_s0 = scalar_lea.vmem %s43_s24, 256  ;;  %p82_p9 = scmp.lt.s32.totalorder %s43_s24, %s43_s24 }
  0x15   :  { %p78_p8 = scmp.ne.s32.totalorder %s43_s24, %s77_s0  ;;  %p83_p10 = scmp.lt.s32.totalorder %s77_s0, %s77_s0 }
  0x17   :  { %p84_p11 = por %p83_p10, %p82_p9 }
  0x19   :  { %p85_p12 = pnand %p84_p11, %p78_p8 }
  0x93   :  { %v30_v4 = vpop.permute.xlu0 %29 }
  0x94   :  { %v32_v5 = vmul.f32 %v30_v4, %v24_v2  ;;  %v33_v6 = vmul.f32 %v30_v4, %v25_v3 }
  0x96   :  { %34 = vst [vmem:[#allocation5] sm:$0xff] %v32_v5  ;;  %35 = vst [vmem:[#allocation5 + $0x8] sm:$0xff] %v33_v6 }
  0x97   :  { %88 = shalt.err (!%p85_p12)
}
  0x98   :  { %s89_s26 = scalar_lea.hbm %s150_s2, 256 }
  0x99   :  { %p90_p13 = scmp.ne.s32.totalorder %s150_s2, %s89_s26  ;;  %p93_p0 = scmp.lt.u32.totalorder %s89_s26, %s150_s2 }
  0x9b   :  { %p95_p1 = pnand %p93_p0, %p90_p13 }
  0x9d   :  { %98 = shalt.err (!%p95_p1)
}
  0x9e   :  { %45 = dma.vmem_to_hbm [thread:$0]  %s43_s24, 256, %s150_s2, [#allocation4]  }
  0x9f   :  { %101 = dma.done.wait [#allocation4], 256  }
  0xa0   :  { %102 = vsyncadd [#allocation4], 4294967040 }
  0xa1   :  { %49 = vsyncpa [#allocation3], 1 }
  0xa2   :  { %50 = vsyncpa [#allocation4], 1 }

</bundles_post_ra>
